<compile_context>
chip_gen: v7x
topology: tpu7x:2x2x1
jax: 0.10.0
libtpu: 0.0.40
codegen_flags: <defaults>
</compile_context>

<pallas_src>
import functools

import jax
import jax.numpy as jnp
from jax.experimental import pallas as pl
from jax.experimental.pallas import tpu as pltpu


# ---------------------------------------------------------------------------
# Helpers
# ---------------------------------------------------------------------------

def _round_up(a, b):
    return (a + b - 1) // b * b


def _vmem_budget_bytes():
    """~75% of physical VMEM: 96 MiB on v5e/v6e, 48 MiB on v7x (48 MiB fallback)."""
    cap = 64 * 1024 * 1024
    try:
        info = pltpu.get_tpu_info()
        cap = int(getattr(info, "vmem_capacity_bytes", cap))
    except Exception:
        pass
    return (cap * 3) // 4


def _gate_update(pre, c_old, peep_ref, fout):
    """Shared gate/cell math.  pre: [rows, 4*F_out] f32 (order i|f|c|o)."""
    w_ci = peep_ref[0:1, :]
    w_cf = peep_ref[1:2, :]
    w_co = peep_ref[2:3, :]
    i_g = jax.nn.sigmoid(pre[:, 0 * fout:1 * fout] + w_ci * c_old)
    f_g = jax.nn.sigmoid(pre[:, 1 * fout:2 * fout] + w_cf * c_old)
    g_g = jnp.tanh(pre[:, 2 * fout:3 * fout])
    c_new = f_g * c_old + i_g * g_g
    o_g = jax.nn.sigmoid(pre[:, 3 * fout:4 * fout] + w_co * c_new)
    h_relu = jnp.maximum(o_g * jnp.tanh(c_new), 0.0)   # h = relu(h) in the wrapper
    return h_relu, c_new


# ---------------------------------------------------------------------------
# Fused kernel (L_hat resident in VMEM, single pallas_call, no grid)
# ---------------------------------------------------------------------------

def gclstm_fused_kernel(x_ref, h_ref, c_ref, lhat_ref, wx_ref, theta_ref,
                        bias_ref, peep_ref, wr_ref, br_ref,
                        out_ref, h_out_ref, c_out_ref):
    """pre = x @ Wx + sum_k T_k(L_hat) H @ Theta_k + bias, recursion in-kernel.

    L_hat is read from HBM exactly once; T_k never round-trips HBM.  Gates,
    peepholes, cell update, ReLU and the linear readout are fused behind it.
    All matmul operands are bf16; accumulation and elementwise math are f32.
    """
    fout = h_ref.shape[1]
    n_cheb = theta_ref.shape[0]

    h32 = h_ref[...]                                   # f32 [N, F_out]
    lhat = lhat_ref[...]                               # bf16 [N, N]

    pre = jnp.dot(x_ref[...], wx_ref[...], preferred_element_type=jnp.float32)
    # T_0(L) H = H
    pre = pre + jnp.dot(h32.astype(jnp.bfloat16), theta_ref[0],
                        preferred_element_type=jnp.float32)
    tx_prev2 = h32                                     # f32 (accurate prev2)
    if n_cheb > 1:
        tx_prev = jnp.dot(lhat, h32.astype(jnp.bfloat16),
                          preferred_element_type=jnp.float32)
        pre = pre + jnp.dot(tx_prev.astype(jnp.bfloat16), theta_ref[1],
                            preferred_element_type=jnp.float32)
        for k in range(2, n_cheb):                     # static K, unrolled
            tx_k = (2.0 * jnp.dot(lhat, tx_prev.astype(jnp.bfloat16),
                                  preferred_element_type=jnp.float32)
                    - tx_prev2)
            pre = pre + jnp.dot(tx_k.astype(jnp.bfloat16), theta_ref[k],
                                preferred_element_type=jnp.float32)
            tx_prev2, tx_prev = tx_prev, tx_k
    pre = pre + bias_ref[...]

    h_relu, c_new = _gate_update(pre, c_ref[...], peep_ref, fout)

    out_ref[...] = (jnp.dot(h_relu.astype(wr_ref.dtype), wr_ref[...],
                            preferred_element_type=jnp.float32) + br_ref[...])
    h_out_ref[...] = h_relu
    c_out_ref[...] = c_new


# ---------------------------------------------------------------------------
# Streamed fallback kernels (row-tiled; only used when L_hat exceeds VMEM)
# ---------------------------------------------------------------------------

def spmm_kernel(lhat_ref, v_ref, out_bf_ref, out_f32_ref):
    """Row panel of T_1 = L_hat @ H (bf16 writeback + f32 copy for prev2)."""
    acc = jnp.dot(lhat_ref[...], v_ref[...], preferred_element_type=jnp.float32)
    out_bf_ref[...] = acc.astype(jnp.bfloat16)
    out_f32_ref[...] = acc


def cheb_step_kernel(lhat_ref, v_ref, prev2_ref, out_bf_ref, out_f32_ref):
    """Row panel of T_k = 2 * L_hat @ T_{k-1} - T_{k-2}."""
    acc = (2.0 * jnp.dot(lhat_ref[...], v_ref[...],
                         preferred_element_type=jnp.float32) - prev2_ref[...])
    out_bf_ref[...] = acc.astype(jnp.bfloat16)
    out_f32_ref[...] = acc


def gclstm_gate_kernel(n_tx, *refs):
    """Gates + cell/hidden update + ReLU + readout for one row tile.

    Per-source dots (x, H, T_1..T_{K-1}) are summed in-kernel instead of
    materializing a concatenated feats slab in HBM.
    """
    x_ref, h_ref, c_ref = refs[0:3]
    tx_refs = refs[3:3 + n_tx]
    wx_ref, theta_ref, bias_ref, peep_ref, wr_ref, br_ref = refs[3 + n_tx:9 + n_tx]
    out_ref, h_out_ref, c_out_ref = refs[9 + n_tx:]

    fout = c_ref.shape[1]
    pre = jnp.dot(x_ref[...], wx_ref[...], preferred_element_type=jnp.float32)
    pre = pre + jnp.dot(h_ref[...], theta_ref[0],
                        preferred_element_type=jnp.float32)
    for j in range(n_tx):
        pre = pre + jnp.dot(tx_refs[j][...], theta_ref[j + 1],
                            preferred_element_type=jnp.float32)
    pre = pre + bias_ref[...]

    h_relu, c_new = _gate_update(pre, c_ref[...], peep_ref, fout)

    out_ref[...] = (jnp.dot(h_relu.astype(wr_ref.dtype), wr_ref[...],
                            preferred_element_type=jnp.float32) + br_ref[...])
    h_out_ref[...] = h_relu
    c_out_ref[...] = c_new


# ---------------------------------------------------------------------------
# Host-side wrapper
# ---------------------------------------------------------------------------

def gclstm_forward(x, h, c, lhat, W, b, Theta, cb, w_peep, Wr, br, *,
                   force_streamed=False):
    N, fin = x.shape
    fout = h.shape[1]
    k_cheb = Theta.shape[1]
    tgt = Wr.shape[1]
    g4 = 4 * fout

    fin_pad = _round_up(fin, 8)
    t_pad = _round_up(tgt, 128)
    n_pad = _round_up(N, 8)
    budget = _vmem_budget_bytes()

    # ----- host-side parameter stacking (gate order i, f, c, o) -------------
    wx = jnp.concatenate([W[g] for g in range(4)], axis=1)                # [Fin, 4F]
    wx = jnp.pad(wx, ((0, fin_pad - fin), (0, 0))).astype(jnp.bfloat16)
    theta_stk = jnp.stack(
        [jnp.concatenate([Theta[g, k] for g in range(4)], axis=1)        # [F, 4F]
         for k in range(k_cheb)], axis=0).astype(jnp.bfloat16)           # [K, F, 4F]
    bias = jnp.concatenate([b[g] + cb[g] for g in range(4)], axis=1)     # [1, 4F]
    peep = w_peep.reshape(3, fout).astype(jnp.float32)                   # [3, F]
    wr_p = jnp.pad(Wr, ((0, 0), (0, t_pad - tgt))).astype(jnp.bfloat16)  # [F, 128]
    br_p = jnp.pad(br, ((0, 0), (0, t_pad - tgt)))                       # [1, 128]

    # ----- fused-path working-set estimate (bytes, conservative) ------------
    fused_bytes = (
        2 * n_pad * n_pad                       # L_hat bf16, resident (read once)
        + n_pad * fin_pad * 2                   # x bf16
        + n_pad * fout * 4 * 8                  # h, c, Cheb temporaries, h/c outs
        + n_pad * g4 * 4 * 3                    # pre + bf16 casts
        + n_pad * t_pad * 4                     # readout output
        + (fin_pad + k_cheb * fout) * g4 * 2 + fout * t_pad * 2
    )
    use_fused = (not force_streamed) and (fused_bytes <= (budget * 4) // 5)

    if use_fused:
        # ---- single fused pallas_call, everything VMEM-resident ------------
        pad_n = n_pad - N
        xp = jnp.pad(x, ((0, pad_n), (0, fin_pad - fin))).astype(jnp.bfloat16)
        hp = jnp.pad(h, ((0, pad_n), (0, 0)))
        cp = jnp.pad(c, ((0, pad_n), (0, 0)))
        lp = jnp.pad(lhat, ((0, pad_n), (0, pad_n))).astype(jnp.bfloat16)

        vspec = pl.BlockSpec(memory_space=pltpu.MemorySpace.VMEM)
        out_p, h_out, c_out = pl.pallas_call(
            gclstm_fused_kernel,
            out_shape=(jax.ShapeDtypeStruct((n_pad, t_pad), jnp.float32),
                       jax.ShapeDtypeStruct((n_pad, fout), jnp.float32),
                       jax.ShapeDtypeStruct((n_pad, fout), jnp.float32)),
            in_specs=[vspec] * 10,
            out_specs=(vspec, vspec, vspec),
            compiler_params=pltpu.CompilerParams(vmem_limit_bytes=budget),
        )(xp, hp, cp, lp, wx, theta_stk, bias, peep, wr_p, br_p)
    else:
        # ---- large-N fallback: stream L_hat in row panels -------------------
        tn = 8
        for cand in (1024, 512, 256, 128, 64, 32, 16, 8):
            if cand <= n_pad and 2 * cand * n_pad * 2 <= budget // 2:
                tn = cand
                break
        if n_pad >= 16:                       # expose >= 2 row tiles (v7x megacore)
            tn = min(tn, _round_up(-(-n_pad // 2), 8))
        n_full = _round_up(n_pad, tn)
        num_tiles = n_full // tn
        pad_n = n_full - N

        xp = jnp.pad(x, ((0, pad_n), (0, fin_pad - fin))).astype(jnp.bfloat16)
        hp = jnp.pad(h, ((0, pad_n), (0, 0)))
        hp_bf = hp.astype(jnp.bfloat16)
        cp = jnp.pad(c, ((0, pad_n), (0, 0)))
        lp = jnp.pad(lhat, ((0, pad_n), (0, pad_n))).astype(jnp.bfloat16)

        cparams = pltpu.CompilerParams(dimension_semantics=("parallel",),
                                       vmem_limit_bytes=budget)
        lhat_spec = pl.BlockSpec((tn, n_full), lambda i: (i, 0))
        full_vec_spec = pl.BlockSpec((n_full, fout), lambda i: (0, 0))
        tile_vec_spec = pl.BlockSpec((tn, fout), lambda i: (i, 0))
        cheb_out_shape = (jax.ShapeDtypeStruct((n_full, fout), jnp.bfloat16),
                          jax.ShapeDtypeStruct((n_full, fout), jnp.float32))

        txs_bf = []                                    # T_1.. in bf16 (gate inputs)
        if k_cheb >= 2:
            cur_bf, cur_f32 = pl.pallas_call(
                spmm_kernel, out_shape=cheb_out_shape, grid=(num_tiles,),
                in_specs=[lhat_spec, full_vec_spec],
                out_specs=(tile_vec_spec, tile_vec_spec),
                compiler_params=cparams,
            )(lp, hp_bf)
            txs_bf.append(cur_bf)
            prev_f32 = hp                              # T_0 in f32
            for _ in range(2, k_cheb):
                nxt_bf, nxt_f32 = pl.pallas_call(
                    cheb_step_kernel, out_shape=cheb_out_shape, grid=(num_tiles,),
                    in_specs=[lhat_spec, full_vec_spec, tile_vec_spec],
                    out_specs=(tile_vec_spec, tile_vec_spec),
                    compiler_params=cparams,
                )(lp, cur_bf, prev_f32)
                txs_bf.append(nxt_bf)
                prev_f32, cur_bf = cur_f32, nxt_bf
                cur_f32 = nxt_f32

        n_tx = len(txs_bf)
        const2 = lambda i: (0, 0)
        in_specs = ([pl.BlockSpec((tn, fin_pad), lambda i: (i, 0)),
                     tile_vec_spec,                    # H  (bf16)
                     tile_vec_spec]                    # C  (f32)
                    + [tile_vec_spec] * n_tx           # T_k(L)H (bf16)
                    + [pl.BlockSpec((fin_pad, g4), const2),
                       pl.BlockSpec((k_cheb, fout, g4), lambda i: (0, 0, 0)),
                       pl.BlockSpec((1, g4), const2),
                       pl.BlockSpec((3, fout), const2),
                       pl.BlockSpec((fout, t_pad), const2),
                       pl.BlockSpec((1, t_pad), const2)])
        out_p, h_out, c_out = pl.pallas_call(
            functools.partial(gclstm_gate_kernel, n_tx),
            out_shape=(jax.ShapeDtypeStruct((n_full, t_pad), jnp.float32),
                       jax.ShapeDtypeStruct((n_full, fout), jnp.float32),
                       jax.ShapeDtypeStruct((n_full, fout), jnp.float32)),
            grid=(num_tiles,),
            in_specs=in_specs,
            out_specs=(pl.BlockSpec((tn, t_pad), lambda i: (i, 0)),
                       tile_vec_spec, tile_vec_spec),
            compiler_params=cparams,
        )(xp, hp_bf, cp, *txs_bf, wx, theta_stk, bias, peep, wr_p, br_p)

    out = out_p[:N, :tgt]
    state = jnp.stack((h_out[:N], c_out[:N]), axis=0)
    return out, state


# ---------------------------------------------------------------------------
# Pure-JAX (f32) reference
# ---------------------------------------------------------------------------

def reference(x, h, c, lhat, W, b, Theta, cb, w_peep, Wr, br):
    K = Theta.shape[1]

    def cheb(g):
        Tx0 = h
        acc = Tx0 @ Theta[g, 0]
        if K > 1:
            Tx1 = lhat @ h
            acc = acc + Tx1 @ Theta[g, 1]
            for k in range(2, K):
                Tx2 = 2.0 * (lhat @ Tx1) - Tx0
                acc = acc + Tx2 @ Theta[g, k]
                Tx0, Tx1 = Tx1, Tx2
        return acc + cb[g]

    pre = [x @ W[g] + cheb(g) + b[g] for g in range(4)]     # order i, f, c, o
    i = jax.nn.sigmoid(pre[0] + w_peep[0] * c)
    f = jax.nn.sigmoid(pre[1] + w_peep[1] * c)
    t = jnp.tanh(pre[2])
    c_new = f * c + i * t
    o = jax.nn.sigmoid(pre[3] + w_peep[2] * c_new)
    h_new = o * jnp.tanh(c_new)
    h_relu = jnp.maximum(h_new, 0.0)
    out = h_relu @ Wr + br
    return out, jnp.stack((h_relu, c_new), axis=0)


# ---------------------------------------------------------------------------
# Test harness
# ---------------------------------------------------------------------------

def _build_scaled_laplacian(N, n_extra, key):
    """Ring graph + random chords → dense scaled Laplacian (get_laplacian, norm=None)."""
    src = jnp.arange(N, dtype=jnp.int32)
    dst = jnp.roll(src, -1)
    A = jnp.zeros((N, N), jnp.float32).at[src, dst].set(1.0).at[dst, src].set(1.0)
    if n_extra > 0:
        ks, kd = jax.random.split(key)
        es = jax.random.randint(ks, (n_extra,), 0, N)
        ed = jax.random.randint(kd, (n_extra,), 0, N)
        A = A.at[es, ed].set(1.0).at[ed, es].set(1.0)
        A = A * (1.0 - jnp.eye(N, dtype=jnp.float32))   # drop accidental self-loops
    deg = A.sum(axis=1)
    L = jnp.diag(deg) - A                               # get_laplacian, normalization=None
    lambda_max = deg.max()                              # edge_weight.max() in the model
    return 2.0 * L / lambda_max - jnp.eye(N, dtype=jnp.float32)


def _check(got, want, name):
    # bf16 matmul operands (f32 accumulation) → relaxed tolerances vs. pure-f32 ref.
    ok = jnp.allclose(got, want, atol=5e-2, rtol=5e-2)
    assert bool(ok), f"{name} mismatch, max abs err {jnp.max(jnp.abs(got - want))}"


def _run_case(key, N, F_IN, F_OUT, K, TGT, n_extra, also_streamed=False):
    ks = jax.random.split(key, 9)
    lhat = _build_scaled_laplacian(N, n_extra, ks[6])

    x = jax.random.normal(ks[0], (N, F_IN), jnp.float32)
    h0 = jax.random.normal(ks[1], (N, F_OUT), jnp.float32) * 0.5
    c0 = jax.random.normal(ks[2], (N, F_OUT), jnp.float32) * 0.5

    W = jax.random.normal(ks[3], (4, F_IN, F_OUT), jnp.float32) * 0.1
    b = jax.random.normal(ks[7], (4, 1, F_OUT), jnp.float32) * 0.05
    Theta = jax.random.normal(ks[4], (4, K, F_OUT, F_OUT), jnp.float32) * 0.1
    cb = jnp.zeros((4, 1, F_OUT), jnp.float32)
    w_peep = jax.random.normal(ks[8], (3, 1, F_OUT), jnp.float32) * 0.1
    Wr = jax.random.normal(ks[5], (F_OUT, TGT), jnp.float32) * 0.1
    br = jnp.zeros((1, TGT), jnp.float32)

    args = (x, h0, c0, lhat, W, b, Theta, cb, w_peep, Wr, br)
    fwd = jax.jit(gclstm_forward, static_argnames=("force_streamed",))

    out, state = fwd(*args)
    jax.block_until_ready((out, state))
    out_ref, state_ref = reference(*args)
    assert out.shape == (N, TGT) and state.shape == (2, N, F_OUT)
    _check(out, out_ref, "out")
    _check(state, state_ref, "state")

    if also_streamed:   # exercise the large-N fallback path on a small graph
        out_s, state_s = fwd(*args, force_streamed=True)
        jax.block_until_ready((out_s, state_s))
        _check(out_s, out_ref, "out (streamed)")
        _check(state_s, state_ref, "state (streamed)")


if __name__ == "__main__":
    key = jax.random.PRNGKey(0)
    k1, k2 = jax.random.split(key)

    # Small case (fused path, everything resident in VMEM).
    _run_case(k1, N=16, F_IN=8, F_OUT=32, K=3, TGT=4, n_extra=2)

    # Larger case: fused path by default; also forces the streamed multi-tile
    # fallback once to validate the large-N code path (N=1000 → 2 row tiles).
    _run_case(k2, N=1000, F_IN=12, F_OUT=32, K=3, TGT=6, n_extra=512,
              also_streamed=True)

    print("KERNEL_OK")
</pallas_src>

<mosaic_0001>
module attributes {stable_mosaic.version = 11 : i64} {
  func.func @gclstm_fused_kernel(%arg0: memref<16x8xbf16, #tpu.memory_space<vmem>>, %arg1: memref<16x32xf32, #tpu.memory_space<vmem>>, %arg2: memref<16x32xf32, #tpu.memory_space<vmem>>, %arg3: memref<16x16xbf16, #tpu.memory_space<vmem>>, %arg4: memref<8x128xbf16, #tpu.memory_space<vmem>>, %arg5: memref<3x32x128xbf16, #tpu.memory_space<vmem>>, %arg6: memref<1x128xf32, #tpu.memory_space<vmem>>, %arg7: memref<3x32xf32, #tpu.memory_space<vmem>>, %arg8: memref<32x128xbf16, #tpu.memory_space<vmem>>, %arg9: memref<1x128xf32, #tpu.memory_space<vmem>>, %arg10: memref<16x128xf32, #tpu.memory_space<vmem>>, %arg11: memref<16x32xf32, #tpu.memory_space<vmem>>, %arg12: memref<16x32xf32, #tpu.memory_space<vmem>>) attributes {dimension_semantics = [], scalar_prefetch = 0 : i64, scratch_operands = 0 : i64, tpu.core_type = #tpu.core_type<tc>} {
    %c0 = arith.constant 0 : index
    %c0_0 = arith.constant 0 : index
    %0 = vector.load %arg1[%c0, %c0_0] : memref<16x32xf32, #tpu.memory_space<vmem>>, vector<16x32xf32>
    %c0_1 = arith.constant 0 : index
    %c0_2 = arith.constant 0 : index
    %1 = vector.load %arg3[%c0_1, %c0_2] : memref<16x16xbf16, #tpu.memory_space<vmem>>, vector<16x16xbf16>
    %c0_3 = arith.constant 0 : index
    %c0_4 = arith.constant 0 : index
    %2 = vector.load %arg0[%c0_3, %c0_4] : memref<16x8xbf16, #tpu.memory_space<vmem>>, vector<16x8xbf16>
    %c0_5 = arith.constant 0 : index
    %c0_6 = arith.constant 0 : index
    %3 = vector.load %arg4[%c0_5, %c0_6] : memref<8x128xbf16, #tpu.memory_space<vmem>>, vector<8x128xbf16>
    %cst = arith.constant dense<0.000000e+00> : vector<16x128xf32>
    %4 = tpu.matmul %2, %3, %cst {dimension_numbers = #tpu.dot_dimension_numbers<[1], [0], [0], [1], [0, 0, 1, 1], [], []>} : vector<16x8xbf16>, vector<8x128xbf16>, vector<16x128xf32> -> vector<16x128xf32>
    %5 = arith.truncf %0 : vector<16x32xf32> to vector<16x32xbf16>
    %c0_7 = arith.constant 0 : index
    %c0_8 = arith.constant 0 : index
    %c0_9 = arith.constant 0 : index
    %6 = vector.load %arg5[%c0_7, %c0_8, %c0_9] : memref<3x32x128xbf16, #tpu.memory_space<vmem>>, vector<1x32x128xbf16>
    %7 = vector.shape_cast %6 : vector<1x32x128xbf16> to vector<32x128xbf16>
    %cst_10 = arith.constant dense<0.000000e+00> : vector<16x128xf32>
    %8 = tpu.matmul %5, %7, %cst_10 {dimension_numbers = #tpu.dot_dimension_numbers<[1], [0], [0], [1], [0, 0, 1, 1], [], []>} : vector<16x32xbf16>, vector<32x128xbf16>, vector<16x128xf32> -> vector<16x128xf32>
    %9 = arith.addf %4, %8 : vector<16x128xf32>
    %10 = arith.truncf %0 : vector<16x32xf32> to vector<16x32xbf16>
    %cst_11 = arith.constant dense<0.000000e+00> : vector<16x32xf32>
    %11 = tpu.matmul %1, %10, %cst_11 {dimension_numbers = #tpu.dot_dimension_numbers<[1], [0], [0], [1], [0, 0, 1, 1], [], []>} : vector<16x16xbf16>, vector<16x32xbf16>, vector<16x32xf32> -> vector<16x32xf32>
    %12 = arith.truncf %11 : vector<16x32xf32> to vector<16x32xbf16>
    %c1 = arith.constant 1 : index
    %c0_12 = arith.constant 0 : index
    %c0_13 = arith.constant 0 : index
    %13 = vector.load %arg5[%c1, %c0_12, %c0_13] : memref<3x32x128xbf16, #tpu.memory_space<vmem>>, vector<1x32x128xbf16>
    %14 = vector.shape_cast %13 : vector<1x32x128xbf16> to vector<32x128xbf16>
    %cst_14 = arith.constant dense<0.000000e+00> : vector<16x128xf32>
    %15 = tpu.matmul %12, %14, %cst_14 {dimension_numbers = #tpu.dot_dimension_numbers<[1], [0], [0], [1], [0, 0, 1, 1], [], []>} : vector<16x32xbf16>, vector<32x128xbf16>, vector<16x128xf32> -> vector<16x128xf32>
    %16 = arith.addf %9, %15 : vector<16x128xf32>
    %17 = arith.truncf %11 : vector<16x32xf32> to vector<16x32xbf16>
    %cst_15 = arith.constant dense<0.000000e+00> : vector<16x32xf32>
    %18 = tpu.matmul %1, %17, %cst_15 {dimension_numbers = #tpu.dot_dimension_numbers<[1], [0], [0], [1], [0, 0, 1, 1], [], []>} : vector<16x16xbf16>, vector<16x32xbf16>, vector<16x32xf32> -> vector<16x32xf32>
    %cst_16 = arith.constant 2.000000e+00 : f32
    %19 = vector.broadcast %cst_16 : f32 to vector<16x32xf32>
    %20 = arith.mulf %19, %18 : vector<16x32xf32>
    %21 = arith.subf %20, %0 : vector<16x32xf32>
    %22 = arith.truncf %21 : vector<16x32xf32> to vector<16x32xbf16>
    %c2 = arith.constant 2 : index
    %c0_17 = arith.constant 0 : index
    %c0_18 = arith.constant 0 : index
    %23 = vector.load %arg5[%c2, %c0_17, %c0_18] : memref<3x32x128xbf16, #tpu.memory_space<vmem>>, vector<1x32x128xbf16>
    %24 = vector.shape_cast %23 : vector<1x32x128xbf16> to vector<32x128xbf16>
    %cst_19 = arith.constant dense<0.000000e+00> : vector<16x128xf32>
    %25 = tpu.matmul %22, %24, %cst_19 {dimension_numbers = #tpu.dot_dimension_numbers<[1], [0], [0], [1], [0, 0, 1, 1], [], []>} : vector<16x32xbf16>, vector<32x128xbf16>, vector<16x128xf32> -> vector<16x128xf32>
    %26 = arith.addf %16, %25 : vector<16x128xf32>
    %c0_20 = arith.constant 0 : index
    %c0_21 = arith.constant 0 : index
    %27 = vector.load %arg6[%c0_20, %c0_21] : memref<1x128xf32, #tpu.memory_space<vmem>>, vector<1x128xf32>
    %28 = vector.broadcast %27 : vector<1x128xf32> to vector<16x128xf32>
    %29 = arith.addf %26, %28 : vector<16x128xf32>
    %c0_22 = arith.constant 0 : index
    %c0_23 = arith.constant 0 : index
    %30 = vector.load %arg2[%c0_22, %c0_23] : memref<16x32xf32, #tpu.memory_space<vmem>>, vector<16x32xf32>
    %c0_24 = arith.constant 0 : index
    %c0_25 = arith.constant 0 : index
    %31 = vector.load %arg7[%c0_24, %c0_25] : memref<3x32xf32, #tpu.memory_space<vmem>>, vector<1x32xf32>
    %c1_26 = arith.constant 1 : index
    %c0_27 = arith.constant 0 : index
    %32 = vector.load %arg7[%c1_26, %c0_27] : memref<3x32xf32, #tpu.memory_space<vmem>>, vector<1x32xf32>
    %c2_28 = arith.constant 2 : index
    %c0_29 = arith.constant 0 : index
    %33 = vector.load %arg7[%c2_28, %c0_29] : memref<3x32xf32, #tpu.memory_space<vmem>>, vector<1x32xf32>
    %34 = vector.extract_strided_slice %29 {offsets = [0, 0], sizes = [16, 32], strides = [1, 1]} : vector<16x128xf32> to vector<16x32xf32>
    %35 = vector.broadcast %31 : vector<1x32xf32> to vector<16x32xf32>
    %36 = arith.mulf %35, %30 : vector<16x32xf32>
    %37 = arith.addf %34, %36 : vector<16x32xf32>
    %38 = arith.negf %37 : vector<16x32xf32>
    %39 = math.exp %38 : vector<16x32xf32>
    %cst_30 = arith.constant 1.000000e+00 : f32
    %40 = vector.broadcast %cst_30 : f32 to vector<16x32xf32>
    %41 = arith.addf %40, %39 : vector<16x32xf32>
    %42 = arith.divf %40, %41 : vector<16x32xf32>
    %43 = vector.extract_strided_slice %29 {offsets = [0, 32], sizes = [16, 32], strides = [1, 1]} : vector<16x128xf32> to vector<16x32xf32>
    %44 = vector.broadcast %32 : vector<1x32xf32> to vector<16x32xf32>
    %45 = arith.mulf %44, %30 : vector<16x32xf32>
    %46 = arith.addf %43, %45 : vector<16x32xf32>
    %47 = arith.negf %46 : vector<16x32xf32>
    %48 = math.exp %47 : vector<16x32xf32>
    %cst_31 = arith.constant 1.000000e+00 : f32
    %49 = vector.broadcast %cst_31 : f32 to vector<16x32xf32>
    %50 = arith.addf %49, %48 : vector<16x32xf32>
    %51 = arith.divf %49, %50 : vector<16x32xf32>
    %52 = vector.extract_strided_slice %29 {offsets = [0, 64], sizes = [16, 32], strides = [1, 1]} : vector<16x128xf32> to vector<16x32xf32>
    %53 = math.tanh %52 : vector<16x32xf32>
    %54 = arith.mulf %51, %30 : vector<16x32xf32>
    %55 = arith.mulf %42, %53 : vector<16x32xf32>
    %56 = arith.addf %54, %55 : vector<16x32xf32>
    %57 = vector.extract_strided_slice %29 {offsets = [0, 96], sizes = [16, 32], strides = [1, 1]} : vector<16x128xf32> to vector<16x32xf32>
    %58 = vector.broadcast %33 : vector<1x32xf32> to vector<16x32xf32>
    %59 = arith.mulf %58, %56 : vector<16x32xf32>
    %60 = arith.addf %57, %59 : vector<16x32xf32>
    %61 = arith.negf %60 : vector<16x32xf32>
    %62 = math.exp %61 : vector<16x32xf32>
    %cst_32 = arith.constant 1.000000e+00 : f32
    %63 = vector.broadcast %cst_32 : f32 to vector<16x32xf32>
    %64 = arith.addf %63, %62 : vector<16x32xf32>
    %65 = arith.divf %63, %64 : vector<16x32xf32>
    %66 = math.tanh %56 : vector<16x32xf32>
    %67 = arith.mulf %65, %66 : vector<16x32xf32>
    %cst_33 = arith.constant 0.000000e+00 : f32
    %68 = vector.broadcast %cst_33 : f32 to vector<16x32xf32>
    %69 = arith.maximumf %67, %68 : vector<16x32xf32>
    %70 = arith.truncf %69 : vector<16x32xf32> to vector<16x32xbf16>
    %c0_34 = arith.constant 0 : index
    %c0_35 = arith.constant 0 : index
    %71 = vector.load %arg8[%c0_34, %c0_35] : memref<32x128xbf16, #tpu.memory_space<vmem>>, vector<32x128xbf16>
    %cst_36 = arith.constant dense<0.000000e+00> : vector<16x128xf32>
    %72 = tpu.matmul %70, %71, %cst_36 {dimension_numbers = #tpu.dot_dimension_numbers<[1], [0], [0], [1], [0, 0, 1, 1], [], []>} : vector<16x32xbf16>, vector<32x128xbf16>, vector<16x128xf32> -> vector<16x128xf32>
    %c0_37 = arith.constant 0 : index
    %c0_38 = arith.constant 0 : index
    %73 = vector.load %arg9[%c0_37, %c0_38] : memref<1x128xf32, #tpu.memory_space<vmem>>, vector<1x128xf32>
    %74 = vector.broadcast %73 : vector<1x128xf32> to vector<16x128xf32>
    %75 = arith.addf %72, %74 : vector<16x128xf32>
    %c0_39 = arith.constant 0 : index
    %c0_40 = arith.constant 0 : index
    %76 = vector.load %arg10[%c0_39, %c0_40] : memref<16x128xf32, #tpu.memory_space<vmem>>, vector<16x128xf32>
    tpu.vector_store %arg10[%c0_39, %c0_40], %75 {strides = array<i32>} : memref<16x128xf32, #tpu.memory_space<vmem>>, vector<16x128xf32>,
    %c0_41 = arith.constant 0 : index
    %c0_42 = arith.constant 0 : index
    %77 = vector.load %arg11[%c0_41, %c0_42] : memref<16x32xf32, #tpu.memory_space<vmem>>, vector<16x32xf32>
    tpu.vector_store %arg11[%c0_41, %c0_42], %69 {strides = array<i32>} : memref<16x32xf32, #tpu.memory_space<vmem>>, vector<16x32xf32>,
    %c0_43 = arith.constant 0 : index
    %c0_44 = arith.constant 0 : index
    %78 = vector.load %arg12[%c0_43, %c0_44] : memref<16x32xf32, #tpu.memory_space<vmem>>, vector<16x32xf32>
    tpu.vector_store %arg12[%c0_43, %c0_44], %56 {strides = array<i32>} : memref<16x32xf32, #tpu.memory_space<vmem>>, vector<16x32xf32>,
    return
  }
}

</mosaic_0001>

<bundles_post_ra>
// kernel: gclstm_forward.1
= control target key start
LH: loop header
LB: loop body
LE: loop exit
PB: predicated region body
PF: predicated region fallthrough
CT: control target
= control target key end

     0   :  { %vm117_vm0 = vcmask 1043456   ;;  %v777_v0 = vmov 0.0   ;;  %vm778_vm1 = vmmov 0   ;;  %vm113_vm2 = vcmask 64512   ;;  %s780_s27 = smov 64   ;;  %s781_s29 = smov 96   ;;  %s993_s4 = inlined_call_operand.vmem [shape: bf16[8,128], index: 4, kind: input, shape index: {}]   ;;  %s994_s5 = inlined_call_operand.vmem [shape: bf16[3,32,128], index: 5, kind: input, shape index: {}]   ;;  %s995_s0 = inlined_call_operand.vmem [shape: bf16[16,8], index: 0, kind: input, shape index: {}]   ;;  %s996_s1 = inlined_call_operand.vmem [shape: f32[16,32], index: 1, kind: input, shape index: {}]   ;;  %s997_s3 = inlined_call_operand.vmem [shape: bf16[16,16], index: 3, kind: input, shape index: {}]   ;;  %s998_s2 = inlined_call_operand.vmem [shape: f32[16,32], index: 2, kind: input, shape index: {}]   ;;  %s999_s7 = inlined_call_operand.vmem [shape: f32[3,32], index: 7, kind: input, shape index: {}]   ;;  %s1000_s6 = inlined_call_operand.vmem [shape: f32[1,128], index: 6, kind: input, shape index: {}]   ;;  %s1001_s12 = inlined_call_operand.vmem [shape: f32[16,32], index: 12, kind: output, shape index: {2}]   ;;  %s1002_s8 = inlined_call_operand.vmem [shape: bf16[32,128], index: 8, kind: input, shape index: {}]   ;;  %s1003_s11 = inlined_call_operand.vmem [shape: f32[16,32], index: 11, kind: output, shape index: {1}]   ;;  %s1004_s9 = inlined_call_operand.vmem [shape: f32[1,128], index: 9, kind: input, shape index: {}]   ;;  %s1005_s10 = inlined_call_operand.vmem [shape: f32[16,128], index: 10, kind: output, shape index: {0}]  }
   0x1   :  { %688 = vmatprep.subr.bf16.mxu1 %v777_v0  ;;  %680 = vmatprep.subr.bf16.mxu0 %v777_v0  ;;  %v45_v1 = vld [vmem:[%s993_s4] sm:$0xf]  ;;  %v737_v5 = vld [vmem:[%s994_s5 + $0x8] sm:$0xff]   ;;  %vm63_vm3 = vcmask 261120   ;;  %vm167_vm4 = vcmask 130048   ;;  %v739_v10 = vld [vmem:[%s994_s5 + $0x10] sm:$0xff]  }
   0x2   :  { %v119_v2 = vsel %vm117_vm0, %v45_v1, 0  ;;  %v735_v3 = vld [vmem:[%s994_s5] sm:$0xff]   ;;  %690 = vmatprep.mubr.msk.bf16.mxu1 %vm778_vm1, %v777_v0  ;;  %684 = vmatprep.mubr.msk.bf16.mxu0 %vm778_vm1, %v777_v0  ;;  %v874_v7 = vld [vmem:[%s996_s1 + $0x8] sm:$0xff]  ;;  %v740_v11 = vld [vmem:[%s994_s5 + $0x18] sm:$0xff]   ;;  %s779_s4 = smov 32  }
   0x3   :  { %689 = vmatpush3.bf16.msra.mxu1 %v119_v2  ;;  %v736_v4 = vld [vmem:[%s995_s0] sm:$0xff]   ;;  %681 = vmatpush3.bf16.msra.mxu0 %v735_v3  ;;  %v742_v28 = vld [vmem:[%s994_s5 + $0x28] sm:$0xff]  }
   0x4   :  { %694 = vmatprep.subr.bf16.mxu1 %v777_v0  ;;  %v869_v6 = vld [vmem:[%s996_s1] sm:$0xff]  ;;  %682 = vmatprep.subr.bf16.mxu0 %v777_v0  ;;  %v395_v30 = vld [vmem:[%s998_s2 + $0x8] sm:$0xff] }
   0x5   :  { %v46_v8 = vpack.c.bf16 %v874_v7, %v869_v6  ;;  %v738_v9 = vld [vmem:[%s997_s3] sm:$0xff]  }
   0x6   :  { %691 = vmatmul.mubr.msk.bf16.vlgmr.msra.gmra.mrb[0].mxu1 %vm113_vm2, %v736_v4  ;;  %v741_v27 = vld [vmem:[%s994_s5 + $0x20] sm:$0xff]  }
   0x7   :  { %695 = vmatpush3.bf16.msra.mxu1 %v46_v8  ;;  %696 = vmatprep.mubr.msk.bf16.mxu1 %vm778_vm1, %v777_v0  ;;  %v394_v29 = vld [vmem:[%s998_s2] sm:$0xff] }
   0x8   :  { %683 = vmatpush3.bf16.msra.mxu0 %v737_v5  ;;  %708 = vmatprep.subr.bf16.mxu1 %v777_v0  ;;  %v652_v31 = vld [vmem:[%s999_s7 + $0x1] ss:$0 sm:$0xff]  ;;  %v648_v50 = vld [vmem:[%s1000_s6] ss:$0 sm:$0xff] }
   0x9   :  { %700 = vmatprep.subr.bf16.mxu0 %v777_v0  ;;  %v423_v32 = vmul.f32 %v652_v31, %v394_v29  ;;  %v424_v33 = vmul.f32 %v652_v31, %v395_v30  ;;  %v649_v60 = vld [vmem:[%s999_s7] ss:$0 sm:$0xff] }
   0xa   :  { %v403_v61 = vmul.f32 %v649_v60, %v394_v29  ;;  %v404_v62 = vmul.f32 %v649_v60, %v395_v30 }
   0xb   :  { %685 = vmatmul.mubr.msk.bf16.vlgmr.msra.gmra.mrb[0].mxu0 %vm63_vm3, %v46_v8  ;;  %427 = vrot.lane.b32.xlu1 %v423_v32, %s779_s4 }
   0xc   :  { %704 = vmatprep.mubr.msk.bf16.mxu0 %vm778_vm1, %v777_v0  ;;  %701 = vmatpush3.bf16.msra.mxu0 %v739_v10 }
   0xd   :  { %702 = vmatprep.subr.bf16.mxu0 %v777_v0 }
   0xe   :  { %697 = vmatmul.mubr.msk.bf16.vlgmr.msra.gmra.mrb[4].mxu1 %vm167_vm4, %v738_v9 }
   0xf   :  { %710 = vmatprep.mubr.msk.bf16.mxu1 %vm778_vm1, %v777_v0  ;;  %429 = vrot.lane.b32.xlu1 %v424_v33, %s779_s4 }
  0x10   :  { %703 = vmatpush3.bf16.msra.mxu0 %v740_v11 }
  0x11   :  { %714 = vmatprep.subr.bf16.mxu0 %v777_v0 }
  0x13   :  { %453 = vrot.lane.b32.xlu1 %v395_v30, %s779_s4 }
  0xd9   :  { %v155_v12 = vpop.f32.mrb[0].mxu1 }
  0xda   :  { %v692_v13 = vpop.f32.mrb[1].mxu1 }
  0xdb   :  { %v158_v14 = vpop.f32.mrb[2].mxu1 }
  0xdc   :  { %v693_v15 = vpop.f32.mrb[3].mxu1 }
  0xde   :  { %v101_v16 = vpop.f32.mrb[0].mxu0 }
  0xdf   :  { %v156_v17 = vadd.f32 %v155_v12, %v101_v16  ;;  %v686_v18 = vpop.f32.mrb[1].mxu0 }
  0xe0   :  { %v104_v19 = vpop.f32.mrb[2].mxu0 }
  0xe1   :  { %v159_v20 = vadd.f32 %v158_v14, %v104_v19  ;;  %v205_v21 = vpop.f32.mrb[4].mxu1  ;;  %v687_v22 = vpop.f32.mrb[3].mxu0 }
  0xe2   :  { %v698_v23 = vpop.f32.mrb[5].mxu1  ;;  %v428_v14 = vpop.permute.xlu1 %427 }
  0xe3   :  { %v208_v24 = vpop.f32.mrb[6].mxu1 }
  0xe4   :  { %v212_v25 = vpack.c.bf16 %v208_v24, %v205_v21  ;;  %v699_v26 = vpop.f32.mrb[7].mxu1 }
  0xe6   :  { %705 = vmatmul.mubr.msk.bf16.vlgmr.msra.gmra.mrb[4].mxu0 %vm63_vm3, %v212_v25  ;;  %709 = vmatpush3.bf16.msra.mxu1 %v212_v25  ;;  %v430_v15 = vpop.permute.xlu1 %429 }
  0xe7   :  { %718 = vmatprep.mubr.msk.bf16.mxu0 %vm778_vm1, %v777_v0  ;;  %722 = vmatprep.subr.bf16.mxu1 %v777_v0 }
  0xe8   :  { %715 = vmatpush3.bf16.msra.mxu0 %v741_v27 }
  0xe9   :  { %711 = vmatmul.mubr.msk.bf16.vlgmr.msra.gmra.mrb[8].mxu1 %vm167_vm4, %v738_v9  ;;  %716 = vmatprep.subr.bf16.mxu0 %v777_v0 }
  0xea   :  { %726 = vmatprep.mubr.msk.bf16.mxu1 %vm778_vm1, %v777_v0 }
  0xec   :  { %717 = vmatpush3.bf16.msra.mxu0 %v742_v28  ;;  %v454_v28 = vpop.permute.xlu1 %453 }
 0x1b9   :  { %v267_v34 = vpop.f32.mrb[4].mxu0 }
 0x1ba   :  { %v274_v35 = vadd.f32 %v267_v34, %v156_v17  ;;  %v706_v36 = vpop.f32.mrb[5].mxu0  ;;  %v655_v34 = vld [vmem:[%s999_s7 + $0x2] ss:$0 sm:$0xff] }
 0x1bb   :  { %v270_v37 = vpop.f32.mrb[6].mxu0 }
 0x1bc   :  { %v275_v38 = vadd.f32 %v270_v37, %v159_v20  ;;  %v707_v39 = vpop.f32.mrb[7].mxu0  ;;  %v310_v40 = vpop.f32.mrb[8].mxu1 }
 0x1bd   :  { %v317_v41 = vmul.f32 2.0, %v310_v40  ;;  %v712_v42 = vpop.f32.mrb[9].mxu1 }
 0x1be   :  { %v313_v43 = vpop.f32.mrb[10].mxu1 }
 0x1bf   :  { %v318_v44 = vmul.f32 2.0, %v313_v43  ;;  %v713_v45 = vpop.f32.mrb[11].mxu1  ;;  %v319_v46 = vsub.f32 %v317_v41, %v869_v6  ;;  %v743_v41 = vld [vmem:[%s1002_s8] sm:$0xff]  }
 0x1c0   :  { %723 = vmatpush3.bf16.msra.mxu1 %v743_v41 }
 0x1c1   :  { %v320_v47 = vsub.f32 %v318_v44, %v874_v7  ;;  %724 = vmatprep.subr.bf16.mxu1 %v777_v0 }
 0x1c3   :  { %v321_v48 = vpack.c.bf16 %v320_v47, %v319_v46 }
 0x1c5   :  { %719 = vmatmul.mubr.msk.bf16.vlgmr.msra.gmra.mrb[8].mxu0 %vm63_vm3, %v321_v48 }
 0x298   :  { %v376_v49 = vpop.f32.mrb[8].mxu0 }
 0x299   :  { %v383_v51 = vadd.f32 %v376_v49, %v274_v35  ;;  %v720_v52 = vpop.f32.mrb[9].mxu0 }
 0x29a   :  { %v379_v53 = vpop.f32.mrb[10].mxu0  ;;  %v744_v52 = vld [vmem:[%s1002_s8 + $0x8] sm:$0xff]  }
 0x29b   :  { %v932_v54 = vadd.f32 %v648_v50, %v383_v51  ;;  %v384_v55 = vadd.f32 %v379_v53, %v275_v38  ;;  %v721_v56 = vpop.f32.mrb[11].mxu0  ;;  %725 = vmatpush3.bf16.msra.mxu1 %v744_v52 }
 0x29d   :  { %v934_v57 = vadd.f32 %v648_v50, %v384_v55  ;;  %745 = vtanh.f32 %v932_v54  ;;  %v405_v63 = vadd.f32 %v403_v61, %v932_v54  ;;  %v433_v16 = vadd.f32 %v428_v14, %v932_v54 }
 0x29f   :  { %747 = vtanh.f32 %v934_v57  ;;  %v650_v1 = vmul.f32 -1.442695, %v405_v63  ;;  %v406_v2 = vadd.f32 %v404_v62, %v934_v57  ;;  %v434_v17 = vadd.f32 %v430_v15, %v934_v57 }
 0x2a0   :  { %v653_v18 = vmul.f32 -1.442695, %v433_v16 }
 0x2a1   :  { %749 = vpow2.f32 %v650_v1  ;;  %v651_v3 = vmul.f32 -1.442695, %v406_v2  ;;  %v654_v19 = vmul.f32 -1.442695, %v434_v17  ;;  %v658_v1 = vld [vmem:[%s1004_s9] ss:$0 sm:$0xff] }
 0x2a3   :  { %751 = vpow2.f32 %v651_v3 }
 0x2a7   :  { %v746_v58 = vpop.eup %745 }
 0x2a8   :  { %461 = vrot.lane.b32.xlu0 %v746_v58, %s780_s27 }
 0x2a9   :  { %v748_v59 = vpop.eup %747 }
 0x2ab   :  { %v750_v4 = vpop.eup %749 }
 0x2ac   :  { %463 = vrot.lane.b32.xlu0 %v748_v59, %s780_s27  ;;  %v413_v5 = vadd.f32 1.0, %v750_v4 }
 0x2ad   :  { %v752_v6 = vpop.eup %751 }
 0x2ae   :  { %753 = vrcp.f32 %v413_v5  ;;  %v414_v7 = vadd.f32 1.0, %v752_v6 }
 0x2b0   :  { %451 = vrot.lane.b32.xlu0 %v394_v29, %s779_s4  ;;  %755 = vrcp.f32 %v414_v7 }
 0x2b1   :  { %757 = vpow2.f32 %v653_v18 }
 0x2b2   :  { %759 = vpow2.f32 %v654_v19 }
 0x2b8   :  { %v754_v8 = vpop.eup %753 }
 0x2ba   :  { %v756_v11 = vpop.eup %755 }
 0x2bb   :  { %v758_v20 = vpop.eup %757 }
 0x2bc   :  { %v760_v21 = vpop.eup %759  ;;  %v441_v22 = vadd.f32 1.0, %v758_v20 }
 0x2bd   :  { %v442_v23 = vadd.f32 1.0, %v760_v21 }
 0x2be   :  { %761 = vrcp.f32 %v441_v22 }
 0x2bf   :  { %763 = vrcp.f32 %v442_v23 }
 0x2c8   :  { %v762_v25 = vpop.eup %761 }
 0x2c9   :  { %v764_v27 = vpop.eup %763 }
 0x2ca   :  { %v458_v31 = vmul.f32 %v764_v27, %v454_v28 }
 0x31a   :  { %v462_v9 = vpop.permute.xlu0 %461 }
 0x31b   :  { %v467_v10 = vmul.f32 %v754_v8, %v462_v9 }
 0x31d   :  { %471 = vrot.lane.b32.xlu0 %v467_v10, %s779_s4 }
 0x31e   :  { %v464_v12 = vpop.permute.xlu0 %463 }
 0x31f   :  { %v468_v13 = vmul.f32 %v756_v11, %v464_v12 }
 0x321   :  { %473 = vrot.lane.b32.xlu1 %v468_v13, %s779_s4 }
 0x322   :  { %v452_v24 = vpop.permute.xlu0 %451 }
 0x323   :  { %v457_v26 = vmul.f32 %v762_v25, %v452_v24 }
 0x38f   :  { %v472_v29 = vpop.permute.xlu0 %471 }
 0x390   :  { %v477_v30 = vadd.f32 %v472_v29, %v457_v26 }
 0x392   :  { %485 = vrot.lane.b32.xlu0 %v477_v30, %s781_s29  ;;  %765 = vtanh.f32 %v477_v30 }
 0x393   :  { %v474_v32 = vpop.permute.xlu1 %473 }
 0x394   :  { %v478_v33 = vadd.f32 %v474_v32, %v458_v31 }
 0x396   :  { %487 = vrot.lane.b32.xlu1 %v478_v33, %s781_s29  ;;  %767 = vtanh.f32 %v478_v33 }
 0x39c   :  { %v766_v39 = vpop.eup %765 }
 0x3a0   :  { %v768_v40 = vpop.eup %767 }
 0x404   :  { %v486_v35 = vpop.permute.xlu0 %485 }
 0x405   :  { %v491_v36 = vmul.f32 %v655_v34, %v486_v35  ;;  %612 = vst.msk [vmem:[%s1001_s12] sm:$0xff] %vm63_vm3, %v486_v35 }
 0x407   :  { %495 = vrot.lane.b32.xlu0 %v491_v36, %s781_s29 }
 0x408   :  { %v488_v37 = vpop.permute.xlu1 %487 }
 0x409   :  { %v492_v38 = vmul.f32 %v655_v34, %v488_v37  ;;  %613 = vst.msk [vmem:[%s1001_s12 + $0x8] sm:$0xff] %vm63_vm3, %v488_v37 }
 0x40b   :  { %519 = vrot.lane.b32.xlu0 %v766_v39, %s780_s27  ;;  %497 = vrot.lane.b32.xlu1 %v492_v38, %s781_s29 }
 0x40f   :  { %521 = vrot.lane.b32.xlu1 %v768_v40, %s780_s27 }
 0x479   :  { %v496_v42 = vpop.permute.xlu0 %495 }
 0x47a   :  { %v501_v43 = vadd.f32 %v496_v42, %v932_v54 }
 0x47c   :  { %v656_v44 = vmul.f32 -1.442695, %v501_v43 }
 0x47d   :  { %v498_v45 = vpop.permute.xlu1 %497  ;;  %v520_v53 = vpop.permute.xlu0 %519 }
 0x47e   :  { %769 = vpow2.f32 %v656_v44  ;;  %v502_v46 = vadd.f32 %v498_v45, %v934_v57 }
 0x480   :  { %v657_v47 = vmul.f32 -1.442695, %v502_v46 }
 0x481   :  { %v522_v58 = vpop.permute.xlu1 %521 }
 0x482   :  { %771 = vpow2.f32 %v657_v47 }
 0x488   :  { %v770_v48 = vpop.eup %769 }
 0x489   :  { %v509_v49 = vadd.f32 1.0, %v770_v48 }
 0x48b   :  { %773 = vrcp.f32 %v509_v49 }
 0x48c   :  { %v772_v50 = vpop.eup %771 }
 0x48d   :  { %v510_v51 = vadd.f32 1.0, %v772_v50 }
 0x48f   :  { %775 = vrcp.f32 %v510_v51 }
 0x495   :  { %v774_v0 = vpop.eup %773 }
 0x496   :  { %v525_v54 = vmul.f32 %v774_v0, %v520_v53 }
 0x498   :  { %v527_v55 = vmax.f32 %v525_v54, 0.0 }
 0x499   :  { %v776_v56 = vpop.eup %775 }
 0x49a   :  { %v526_v57 = vmul.f32 %v776_v56, %v522_v58  ;;  %604 = vrot.lane.b32.xlu1 %v527_v55, %s779_s4 }
 0x49c   :  { %v528_v59 = vmax.f32 %v526_v57, 0.0 }
 0x49e   :  { %v529_v60 = vpack.c.bf16 %v528_v59, %v527_v55 }
 0x4a0   :  { %542 = vrot.lane.b32.xlu0 %v529_v60, %s779_s4 }
 0x4a4   :  { %606 = vrot.lane.b32.xlu0 %v528_v59, %s779_s4 }
 0x50c   :  { %v605_v61 = vpop.permute.xlu1 %604 }
 0x50d   :  { %610 = vst.msk [vmem:[%s1003_s11] sm:$0xff] %vm63_vm3, %v605_v61 }
 0x512   :  { %v543_v62 = vpop.permute.xlu0 %542 }
 0x513   :  { %727 = vmatmul.mubr.msk.bf16.vlgmr.msra.gmra.mrb[12].mxu1 %vm63_vm3, %v543_v62 }
 0x516   :  { %v607_v63 = vpop.permute.xlu0 %606 }
 0x517   :  { %611 = vst.msk [vmem:[%s1003_s11 + $0x8] sm:$0xff] %vm63_vm3, %v607_v63 }
 0x5e6   :  { %v593_v2 = vpop.f32.mrb[12].mxu1 }
 0x5e7   :  { %v594_v3 = vadd.f32 %v658_v1, %v593_v2  ;;  %v728_v4 = vpop.f32.mrb[13].mxu1 }
 0x5e8   :  { %v596_v5 = vpop.f32.mrb[14].mxu1 }
 0x5e9   :  { %600 = vst [vmem:[%s1005_s10] sm:$0xff] %v594_v3  ;;  %v597_v6 = vadd.f32 %v658_v1, %v596_v5  ;;  %v729_v7 = vpop.f32.mrb[15].mxu1 }
 0x5eb   :  { %601 = vst [vmem:[%s1005_s10 + $0x8] sm:$0xff] %v597_v6 }

</bundles_post_ra>
